<compile_context>
chip_gen: v7x
topology: tpu7x:2x2x1
jax: 0.10.0
libtpu: 0.0.40
codegen_flags: <defaults>
</compile_context>

<pallas_src>
import functools

import jax
import jax.numpy as jnp
from jax.experimental import pallas as pl
from jax.experimental.pallas import tpu as pltpu


_LANE = 128
_SUBLANE = 8
# Padded tables up to this many bytes are kept resident in VMEM (safe w.r.t.
# the default scoped VMEM budget on v5e/v6e/v7x, leaving room for the
# double-buffered output blocks).
_VMEM_TABLE_BYTES = 8 * 1024 * 1024


def _round_up(x, m):
    return ((x + m - 1) // m) * m


# --------------------------------------------------------------------------
# Kernels
# --------------------------------------------------------------------------
def _vmem_gather_kernel(ids_sm, table_ref, out_ref):
    """Gather TQ rows from a VMEM-resident table (no per-row HBM DMA).

    ids_sm:    (N_pad,) int32 in SMEM (scalar prefetch), all in [0, V_pad).
    table_ref: (V_pad, E_pad) float32, full table resident in VMEM.
    out_ref:   (TQ, E_pad) float32 output block.
    """
    i = pl.program_id(0)
    tq = out_ref.shape[0]
    base = i * tq

    @pl.loop(0, tq, unroll=tq <= 32)
    def _(q):
        idx = ids_sm[base + q]                      # scalar read (SMEM)
        out_ref[pl.ds(q, 1), :] = table_ref[pl.ds(idx, 1), :]


def _hbm_gather_kernel(ids_sm, table_hbm, out_ref, sems):
    """Gather TQ rows straight from the HBM table into the output block.

    All TQ row DMAs are issued before any wait, so they are concurrently in
    flight (the kernel is DMA-latency bound, not bandwidth bound).  Rows are
    DMA'd directly into out_ref (no scratch bounce).
    """
    i = pl.program_id(0)
    tq = out_ref.shape[0]
    base = i * tq

    @pl.loop(0, tq)
    def _(q):
        idx = ids_sm[base + q]
        pltpu.make_async_copy(table_hbm.at[idx], out_ref.at[q],
                              sems.at[q]).start()

    @pl.loop(0, tq)
    def _(q):
        # Only the copy shape matters for the wait; .at[0] matches .at[idx].
        pltpu.make_async_copy(table_hbm.at[0], out_ref.at[q],
                              sems.at[q]).wait()


# --------------------------------------------------------------------------
# Wrapper
# --------------------------------------------------------------------------
@functools.partial(jax.jit, static_argnames=("tq", "table_in_vmem"))
def _embedding_lookup(ids_padded, table_padded, *, tq, table_in_vmem):
    """Batched gather: (N_pad,) int32 ids (already in [0, V_pad)) -> rows."""
    n_pad = ids_padded.shape[0]
    v_pad, e_pad = table_padded.shape
    itemsize = table_padded.dtype.itemsize
    grid = (n_pad // tq,)

    if table_in_vmem:
        kernel = _vmem_gather_kernel
        # Constant block index => the whole table stays resident in VMEM
        # across grid steps (fetched once).
        table_spec = pl.BlockSpec((v_pad, e_pad), lambda i, ids: (0, 0))
        scratch = []
        table_bytes = v_pad * e_pad * itemsize
    else:
        kernel = _hbm_gather_kernel
        table_spec = pl.BlockSpec(memory_space=pl.ANY)   # raw HBM ref
        scratch = [pltpu.SemaphoreType.DMA((tq,))]       # one sem per row DMA
        table_bytes = n_pad * e_pad * itemsize           # only gathered rows

    return pl.pallas_call(
        kernel,
        out_shape=jax.ShapeDtypeStruct((n_pad, e_pad), table_padded.dtype),
        grid_spec=pltpu.PrefetchScalarGridSpec(
            num_scalar_prefetch=1,                        # ids -> SMEM
            grid=grid,
            in_specs=[table_spec],
            out_specs=pl.BlockSpec((tq, e_pad), lambda i, ids: (i, 0)),
            scratch_shapes=scratch,
        ),
        compiler_params=pltpu.CompilerParams(
            # Query blocks are independent -> shard across TCs on v7x,
            # harmless on single-TC v5e/v6e.
            dimension_semantics=("parallel",),
        ),
        cost_estimate=pl.CostEstimate(
            flops=0,
            transcendentals=0,
            bytes_accessed=table_bytes            # table rows read
            + n_pad * e_pad * itemsize            # output written
            + n_pad * 4,                          # ids read
        ),
    )(ids_padded, table_padded)


# --------------------------------------------------------------------------
# Module
# --------------------------------------------------------------------------
class Embedding:
    """Pallas-backed equivalent of the PyTorch Embedding module."""

    def __init__(self, alphabet, emb_size: int, key=None):
        # Fixed, sorted order => deterministic symbol -> row mapping.
        self.alphabet = sorted(alphabet)
        self.emb_size = int(emb_size)
        self.vocab = len(self.alphabet)
        self.sym2id = {s: i for i, s in enumerate(self.alphabet)}
        if key is None:
            key = jax.random.PRNGKey(0)
        self.table = jax.random.normal(
            key, (self.vocab, self.emb_size), dtype=jnp.float32)

        # ---- one-time table prep (hoisted out of the per-call path) ----
        #  * pad E to a lane multiple so output stores are lane-dense,
        #  * append all-zero rows; unknown symbols index the first zero row,
        #    so the gather itself yields the "KeyError -> zeros" semantics.
        e_pad = _round_up(max(self.emb_size, 1), _LANE)
        v_pad = _round_up(self.vocab + 1, _SUBLANE)
        tbl = jnp.zeros((v_pad, e_pad), jnp.float32)
        tbl = tbl.at[:self.vocab, :self.emb_size].set(self.table)
        self.table_padded = tbl
        self.zero_id = self.vocab                        # all-zeros row index
        self.table_in_vmem = (v_pad * e_pad * 4) <= _VMEM_TABLE_BYTES

    # -- id construction (host side) ------------------------------------
    def _ids(self, syms):
        get = self.sym2id.get
        z = self.zero_id
        return [get(s, z) for s in syms]

    # -- forward ---------------------------------------------------------
    def forward(self, sym):
        """Embed a single symbol -> (emb_size,) vector (zeros if unknown)."""
        return self.forward_batch([sym])[0]

    def forward_batch(self, syms, *, tq=128):
        """Embed a list of symbols -> (len(syms), emb_size)."""
        n = len(syms)
        # Bucket the rows-per-grid-step and the padded batch length so the
        # set of compiled kernel shapes stays small.
        tq = _round_up(min(tq, _round_up(max(n, 1), _SUBLANE)), _SUBLANE)
        n_pad = _round_up(max(n, 1), tq)
        ids = jnp.full((n_pad,), self.zero_id, dtype=jnp.int32)
        ids = ids.at[:n].set(jnp.asarray(self._ids(syms), dtype=jnp.int32))
        out = _embedding_lookup(ids, self.table_padded, tq=tq,
                                table_in_vmem=self.table_in_vmem)
        return out[:n, :self.emb_size]

    def params(self):
        # TODO(synk): requires_grad / autograd bookkeeping is PyTorch-side;
        # here params is simply the list of embedding table rows.
        return [self.table[i] for i in range(self.vocab)]


# --------------------------------------------------------------------------
# Demo / self-check
# --------------------------------------------------------------------------
if __name__ == "__main__":
    emb_size = 32
    alphabet = set("abcdefghijklmnopqrstuvwxyz")           # V = 26
    emb = Embedding(alphabet, emb_size, key=jax.random.PRNGKey(0))

    # Queries, including unknown symbols (-> zeros, like the KeyError branch).
    query_syms = ["a", "c", "z", "h", "b", "??", "d", "a",
                  "q", "x", "!", "m", "n", "zz", "e", "f", "y", "k"]

    out = jax.block_until_ready(emb.forward_batch(query_syms))

    # Pure-JAX reference for correctness.
    ids_ref = jnp.asarray([emb.sym2id.get(s, -1) for s in query_syms],
                          dtype=jnp.int32)
    ref = jnp.where(
        ids_ref[:, None] >= 0,
        emb.table[jnp.clip(ids_ref, 0), :],
        jnp.zeros((1, emb_size), jnp.float32),
    )
    assert out.shape == (len(query_syms), emb_size)
    assert out.dtype == jnp.float32
    assert jnp.allclose(out, ref, atol=1e-6), "VMEM-path embedding mismatch"

    # Also exercise the HBM-gather fallback (used for tables too large to
    # keep resident in VMEM) on the same data.
    emb.table_in_vmem = False
    out_hbm = jax.block_until_ready(emb.forward_batch(query_syms))
    assert jnp.allclose(out_hbm, ref, atol=1e-6), "HBM-path embedding mismatch"
    emb.table_in_vmem = True

    # Single-symbol module API, matching the PyTorch doctest semantics.
    single = jax.block_until_ready(emb.forward("a"))
    assert single.shape == (emb_size,)
    assert jnp.allclose(single, emb.table[emb.sym2id["a"]], atol=1e-6)
    unknown = jax.block_until_ready(emb.forward("??"))
    assert jnp.allclose(unknown, jnp.zeros((emb_size,), jnp.float32))

    print("KERNEL_OK")
</pallas_src>

<mosaic_0001>
module attributes {stable_mosaic.version = 11 : i64} {
  func.func @_vmem_gather_kernel(%arg0: i32, %arg1: memref<24xi32, #tpu.memory_space<smem>>, %arg2: memref<32x128xf32, #tpu.memory_space<vmem>>, %arg3: memref<24x128xf32, #tpu.memory_space<vmem>>) attributes {dimension_semantics = [#tpu.dimension_semantics<parallel>], iteration_bounds = array<i64: 1>, scalar_prefetch = 1 : i64, scratch_operands = 0 : i64, tpu.core_type = #tpu.core_type<tc>, window_params = [{pipeline_mode = #tpu.pipeline_mode<synchronous>, transform_indices = @transform_0, window_bounds = array<i64: 32, 128>}, {transform_indices = @transform_1, window_bounds = array<i64: 24, 128>}]} {
    %c24_i32 = arith.constant 24 : i32
    %0 = arith.muli %arg0, %c24_i32 : i32
    %c0_i32 = arith.constant 0 : i32
    %c1_i32 = arith.constant 1 : i32
    %1 = arith.muli %c0_i32, %c1_i32 : i32
    %c0_i32_0 = arith.constant 0 : i32
    %2 = arith.addi %c0_i32_0, %1 : i32
    %3 = arith.addi %0, %2 : i32
    %4 = arith.index_cast %3 : i32 to index
    %5 = memref.load %arg1[%4] : memref<24xi32, #tpu.memory_space<smem>>
    %6 = arith.index_cast %5 : i32 to index
    %c0 = arith.constant 0 : index
    %7 = vector.load %arg2[%6, %c0] : memref<32x128xf32, #tpu.memory_space<vmem>>, vector<1x128xf32>
    %8 = arith.index_cast %2 : i32 to index
    %c0_1 = arith.constant 0 : index
    %9 = vector.load %arg3[%8, %c0_1] : memref<24x128xf32, #tpu.memory_space<vmem>>, vector<1x128xf32>
    tpu.vector_store %arg3[%8, %c0_1], %7 {strides = array<i32>} : memref<24x128xf32, #tpu.memory_space<vmem>>, vector<1x128xf32>,
    %c1_i32_2 = arith.constant 1 : i32
    %c1_i32_3 = arith.constant 1 : i32
    %10 = arith.muli %c1_i32_2, %c1_i32_3 : i32
    %c0_i32_4 = arith.constant 0 : i32
    %11 = arith.addi %c0_i32_4, %10 : i32
    %12 = arith.addi %0, %11 : i32
    %13 = arith.index_cast %12 : i32 to index
    %14 = memref.load %arg1[%13] : memref<24xi32, #tpu.memory_space<smem>>
    %15 = arith.index_cast %14 : i32 to index
    %c0_5 = arith.constant 0 : index
    %16 = vector.load %arg2[%15, %c0_5] : memref<32x128xf32, #tpu.memory_space<vmem>>, vector<1x128xf32>
    %17 = arith.index_cast %11 : i32 to index
    %c0_6 = arith.constant 0 : index
    %18 = vector.load %arg3[%17, %c0_6] : memref<24x128xf32, #tpu.memory_space<vmem>>, vector<1x128xf32>
    tpu.vector_store %arg3[%17, %c0_6], %16 {strides = array<i32>} : memref<24x128xf32, #tpu.memory_space<vmem>>, vector<1x128xf32>,
    %c2_i32 = arith.constant 2 : i32
    %c1_i32_7 = arith.constant 1 : i32
    %19 = arith.muli %c2_i32, %c1_i32_7 : i32
    %c0_i32_8 = arith.constant 0 : i32
    %20 = arith.addi %c0_i32_8, %19 : i32
    %21 = arith.addi %0, %20 : i32
    %22 = arith.index_cast %21 : i32 to index
    %23 = memref.load %arg1[%22] : memref<24xi32, #tpu.memory_space<smem>>
    %24 = arith.index_cast %23 : i32 to index
    %c0_9 = arith.constant 0 : index
    %25 = vector.load %arg2[%24, %c0_9] : memref<32x128xf32, #tpu.memory_space<vmem>>, vector<1x128xf32>
    %26 = arith.index_cast %20 : i32 to index
    %c0_10 = arith.constant 0 : index
    %27 = vector.load %arg3[%26, %c0_10] : memref<24x128xf32, #tpu.memory_space<vmem>>, vector<1x128xf32>
    tpu.vector_store %arg3[%26, %c0_10], %25 {strides = array<i32>} : memref<24x128xf32, #tpu.memory_space<vmem>>, vector<1x128xf32>,
    %c3_i32 = arith.constant 3 : i32
    %c1_i32_11 = arith.constant 1 : i32
    %28 = arith.muli %c3_i32, %c1_i32_11 : i32
    %c0_i32_12 = arith.constant 0 : i32
    %29 = arith.addi %c0_i32_12, %28 : i32
    %30 = arith.addi %0, %29 : i32
    %31 = arith.index_cast %30 : i32 to index
    %32 = memref.load %arg1[%31] : memref<24xi32, #tpu.memory_space<smem>>
    %33 = arith.index_cast %32 : i32 to index
    %c0_13 = arith.constant 0 : index
    %34 = vector.load %arg2[%33, %c0_13] : memref<32x128xf32, #tpu.memory_space<vmem>>, vector<1x128xf32>
    %35 = arith.index_cast %29 : i32 to index
    %c0_14 = arith.constant 0 : index
    %36 = vector.load %arg3[%35, %c0_14] : memref<24x128xf32, #tpu.memory_space<vmem>>, vector<1x128xf32>
    tpu.vector_store %arg3[%35, %c0_14], %34 {strides = array<i32>} : memref<24x128xf32, #tpu.memory_space<vmem>>, vector<1x128xf32>,
    %c4_i32 = arith.constant 4 : i32
    %c1_i32_15 = arith.constant 1 : i32
    %37 = arith.muli %c4_i32, %c1_i32_15 : i32
    %c0_i32_16 = arith.constant 0 : i32
    %38 = arith.addi %c0_i32_16, %37 : i32
    %39 = arith.addi %0, %38 : i32
    %40 = arith.index_cast %39 : i32 to index
    %41 = memref.load %arg1[%40] : memref<24xi32, #tpu.memory_space<smem>>
    %42 = arith.index_cast %41 : i32 to index
    %c0_17 = arith.constant 0 : index
    %43 = vector.load %arg2[%42, %c0_17] : memref<32x128xf32, #tpu.memory_space<vmem>>, vector<1x128xf32>
    %44 = arith.index_cast %38 : i32 to index
    %c0_18 = arith.constant 0 : index
    %45 = vector.load %arg3[%44, %c0_18] : memref<24x128xf32, #tpu.memory_space<vmem>>, vector<1x128xf32>
    tpu.vector_store %arg3[%44, %c0_18], %43 {strides = array<i32>} : memref<24x128xf32, #tpu.memory_space<vmem>>, vector<1x128xf32>,
    %c5_i32 = arith.constant 5 : i32
    %c1_i32_19 = arith.constant 1 : i32
    %46 = arith.muli %c5_i32, %c1_i32_19 : i32
    %c0_i32_20 = arith.constant 0 : i32
    %47 = arith.addi %c0_i32_20, %46 : i32
    %48 = arith.addi %0, %47 : i32
    %49 = arith.index_cast %48 : i32 to index
    %50 = memref.load %arg1[%49] : memref<24xi32, #tpu.memory_space<smem>>
    %51 = arith.index_cast %50 : i32 to index
    %c0_21 = arith.constant 0 : index
    %52 = vector.load %arg2[%51, %c0_21] : memref<32x128xf32, #tpu.memory_space<vmem>>, vector<1x128xf32>
    %53 = arith.index_cast %47 : i32 to index
    %c0_22 = arith.constant 0 : index
    %54 = vector.load %arg3[%53, %c0_22] : memref<24x128xf32, #tpu.memory_space<vmem>>, vector<1x128xf32>
    tpu.vector_store %arg3[%53, %c0_22], %52 {strides = array<i32>} : memref<24x128xf32, #tpu.memory_space<vmem>>, vector<1x128xf32>,
    %c6_i32 = arith.constant 6 : i32
    %c1_i32_23 = arith.constant 1 : i32
    %55 = arith.muli %c6_i32, %c1_i32_23 : i32
    %c0_i32_24 = arith.constant 0 : i32
    %56 = arith.addi %c0_i32_24, %55 : i32
    %57 = arith.addi %0, %56 : i32
    %58 = arith.index_cast %57 : i32 to index
    %59 = memref.load %arg1[%58] : memref<24xi32, #tpu.memory_space<smem>>
    %60 = arith.index_cast %59 : i32 to index
    %c0_25 = arith.constant 0 : index
    %61 = vector.load %arg2[%60, %c0_25] : memref<32x128xf32, #tpu.memory_space<vmem>>, vector<1x128xf32>
    %62 = arith.index_cast %56 : i32 to index
    %c0_26 = arith.constant 0 : index
    %63 = vector.load %arg3[%62, %c0_26] : memref<24x128xf32, #tpu.memory_space<vmem>>, vector<1x128xf32>
    tpu.vector_store %arg3[%62, %c0_26], %61 {strides = array<i32>} : memref<24x128xf32, #tpu.memory_space<vmem>>, vector<1x128xf32>,
    %c7_i32 = arith.constant 7 : i32
    %c1_i32_27 = arith.constant 1 : i32
    %64 = arith.muli %c7_i32, %c1_i32_27 : i32
    %c0_i32_28 = arith.constant 0 : i32
    %65 = arith.addi %c0_i32_28, %64 : i32
    %66 = arith.addi %0, %65 : i32
    %67 = arith.index_cast %66 : i32 to index
    %68 = memref.load %arg1[%67] : memref<24xi32, #tpu.memory_space<smem>>
    %69 = arith.index_cast %68 : i32 to index
    %c0_29 = arith.constant 0 : index
    %70 = vector.load %arg2[%69, %c0_29] : memref<32x128xf32, #tpu.memory_space<vmem>>, vector<1x128xf32>
    %71 = arith.index_cast %65 : i32 to index
    %c0_30 = arith.constant 0 : index
    %72 = vector.load %arg3[%71, %c0_30] : memref<24x128xf32, #tpu.memory_space<vmem>>, vector<1x128xf32>
    tpu.vector_store %arg3[%71, %c0_30], %70 {strides = array<i32>} : memref<24x128xf32, #tpu.memory_space<vmem>>, vector<1x128xf32>,
    %c8_i32 = arith.constant 8 : i32
    %c1_i32_31 = arith.constant 1 : i32
    %73 = arith.muli %c8_i32, %c1_i32_31 : i32
    %c0_i32_32 = arith.constant 0 : i32
    %74 = arith.addi %c0_i32_32, %73 : i32
    %75 = arith.addi %0, %74 : i32
    %76 = arith.index_cast %75 : i32 to index
    %77 = memref.load %arg1[%76] : memref<24xi32, #tpu.memory_space<smem>>
    %78 = arith.index_cast %77 : i32 to index
    %c0_33 = arith.constant 0 : index
    %79 = vector.load %arg2[%78, %c0_33] : memref<32x128xf32, #tpu.memory_space<vmem>>, vector<1x128xf32>
    %80 = arith.index_cast %74 : i32 to index
    %c0_34 = arith.constant 0 : index
    %81 = vector.load %arg3[%80, %c0_34] : memref<24x128xf32, #tpu.memory_space<vmem>>, vector<1x128xf32>
    tpu.vector_store %arg3[%80, %c0_34], %79 {strides = array<i32>} : memref<24x128xf32, #tpu.memory_space<vmem>>, vector<1x128xf32>,
    %c9_i32 = arith.constant 9 : i32
    %c1_i32_35 = arith.constant 1 : i32
    %82 = arith.muli %c9_i32, %c1_i32_35 : i32
    %c0_i32_36 = arith.constant 0 : i32
    %83 = arith.addi %c0_i32_36, %82 : i32
    %84 = arith.addi %0, %83 : i32
    %85 = arith.index_cast %84 : i32 to index
    %86 = memref.load %arg1[%85] : memref<24xi32, #tpu.memory_space<smem>>
    %87 = arith.index_cast %86 : i32 to index
    %c0_37 = arith.constant 0 : index
    %88 = vector.load %arg2[%87, %c0_37] : memref<32x128xf32, #tpu.memory_space<vmem>>, vector<1x128xf32>
    %89 = arith.index_cast %83 : i32 to index
    %c0_38 = arith.constant 0 : index
    %90 = vector.load %arg3[%89, %c0_38] : memref<24x128xf32, #tpu.memory_space<vmem>>, vector<1x128xf32>
    tpu.vector_store %arg3[%89, %c0_38], %88 {strides = array<i32>} : memref<24x128xf32, #tpu.memory_space<vmem>>, vector<1x128xf32>,
    %c10_i32 = arith.constant 10 : i32
    %c1_i32_39 = arith.constant 1 : i32
    %91 = arith.muli %c10_i32, %c1_i32_39 : i32
    %c0_i32_40 = arith.constant 0 : i32
    %92 = arith.addi %c0_i32_40, %91 : i32
    %93 = arith.addi %0, %92 : i32
    %94 = arith.index_cast %93 : i32 to index
    %95 = memref.load %arg1[%94] : memref<24xi32, #tpu.memory_space<smem>>
    %96 = arith.index_cast %95 : i32 to index
    %c0_41 = arith.constant 0 : index
    %97 = vector.load %arg2[%96, %c0_41] : memref<32x128xf32, #tpu.memory_space<vmem>>, vector<1x128xf32>
    %98 = arith.index_cast %92 : i32 to index
    %c0_42 = arith.constant 0 : index
    %99 = vector.load %arg3[%98, %c0_42] : memref<24x128xf32, #tpu.memory_space<vmem>>, vector<1x128xf32>
    tpu.vector_store %arg3[%98, %c0_42], %97 {strides = array<i32>} : memref<24x128xf32, #tpu.memory_space<vmem>>, vector<1x128xf32>,
    %c11_i32 = arith.constant 11 : i32
    %c1_i32_43 = arith.constant 1 : i32
    %100 = arith.muli %c11_i32, %c1_i32_43 : i32
    %c0_i32_44 = arith.constant 0 : i32
    %101 = arith.addi %c0_i32_44, %100 : i32
    %102 = arith.addi %0, %101 : i32
    %103 = arith.index_cast %102 : i32 to index
    %104 = memref.load %arg1[%103] : memref<24xi32, #tpu.memory_space<smem>>
    %105 = arith.index_cast %104 : i32 to index
    %c0_45 = arith.constant 0 : index
    %106 = vector.load %arg2[%105, %c0_45] : memref<32x128xf32, #tpu.memory_space<vmem>>, vector<1x128xf32>
    %107 = arith.index_cast %101 : i32 to index
    %c0_46 = arith.constant 0 : index
    %108 = vector.load %arg3[%107, %c0_46] : memref<24x128xf32, #tpu.memory_space<vmem>>, vector<1x128xf32>
    tpu.vector_store %arg3[%107, %c0_46], %106 {strides = array<i32>} : memref<24x128xf32, #tpu.memory_space<vmem>>, vector<1x128xf32>,
    %c12_i32 = arith.constant 12 : i32
    %c1_i32_47 = arith.constant 1 : i32
    %109 = arith.muli %c12_i32, %c1_i32_47 : i32
    %c0_i32_48 = arith.constant 0 : i32
    %110 = arith.addi %c0_i32_48, %109 : i32
    %111 = arith.addi %0, %110 : i32
    %112 = arith.index_cast %111 : i32 to index
    %113 = memref.load %arg1[%112] : memref<24xi32, #tpu.memory_space<smem>>
    %114 = arith.index_cast %113 : i32 to index
    %c0_49 = arith.constant 0 : index
    %115 = vector.load %arg2[%114, %c0_49] : memref<32x128xf32, #tpu.memory_space<vmem>>, vector<1x128xf32>
    %116 = arith.index_cast %110 : i32 to index
    %c0_50 = arith.constant 0 : index
    %117 = vector.load %arg3[%116, %c0_50] : memref<24x128xf32, #tpu.memory_space<vmem>>, vector<1x128xf32>
    tpu.vector_store %arg3[%116, %c0_50], %115 {strides = array<i32>} : memref<24x128xf32, #tpu.memory_space<vmem>>, vector<1x128xf32>,
    %c13_i32 = arith.constant 13 : i32
    %c1_i32_51 = arith.constant 1 : i32
    %118 = arith.muli %c13_i32, %c1_i32_51 : i32
    %c0_i32_52 = arith.constant 0 : i32
    %119 = arith.addi %c0_i32_52, %118 : i32
    %120 = arith.addi %0, %119 : i32
    %121 = arith.index_cast %120 : i32 to index
    %122 = memref.load %arg1[%121] : memref<24xi32, #tpu.memory_space<smem>>
    %123 = arith.index_cast %122 : i32 to index
    %c0_53 = arith.constant 0 : index
    %124 = vector.load %arg2[%123, %c0_53] : memref<32x128xf32, #tpu.memory_space<vmem>>, vector<1x128xf32>
    %125 = arith.index_cast %119 : i32 to index
    %c0_54 = arith.constant 0 : index
    %126 = vector.load %arg3[%125, %c0_54] : memref<24x128xf32, #tpu.memory_space<vmem>>, vector<1x128xf32>
    tpu.vector_store %arg3[%125, %c0_54], %124 {strides = array<i32>} : memref<24x128xf32, #tpu.memory_space<vmem>>, vector<1x128xf32>,
    %c14_i32 = arith.constant 14 : i32
    %c1_i32_55 = arith.constant 1 : i32
    %127 = arith.muli %c14_i32, %c1_i32_55 : i32
    %c0_i32_56 = arith.constant 0 : i32
    %128 = arith.addi %c0_i32_56, %127 : i32
    %129 = arith.addi %0, %128 : i32
    %130 = arith.index_cast %129 : i32 to index
    %131 = memref.load %arg1[%130] : memref<24xi32, #tpu.memory_space<smem>>
    %132 = arith.index_cast %131 : i32 to index
    %c0_57 = arith.constant 0 : index
    %133 = vector.load %arg2[%132, %c0_57] : memref<32x128xf32, #tpu.memory_space<vmem>>, vector<1x128xf32>
    %134 = arith.index_cast %128 : i32 to index
    %c0_58 = arith.constant 0 : index
    %135 = vector.load %arg3[%134, %c0_58] : memref<24x128xf32, #tpu.memory_space<vmem>>, vector<1x128xf32>
    tpu.vector_store %arg3[%134, %c0_58], %133 {strides = array<i32>} : memref<24x128xf32, #tpu.memory_space<vmem>>, vector<1x128xf32>,
    %c15_i32 = arith.constant 15 : i32
    %c1_i32_59 = arith.constant 1 : i32
    %136 = arith.muli %c15_i32, %c1_i32_59 : i32
    %c0_i32_60 = arith.constant 0 : i32
    %137 = arith.addi %c0_i32_60, %136 : i32
    %138 = arith.addi %0, %137 : i32
    %139 = arith.index_cast %138 : i32 to index
    %140 = memref.load %arg1[%139] : memref<24xi32, #tpu.memory_space<smem>>
    %141 = arith.index_cast %140 : i32 to index
    %c0_61 = arith.constant 0 : index
    %142 = vector.load %arg2[%141, %c0_61] : memref<32x128xf32, #tpu.memory_space<vmem>>, vector<1x128xf32>
    %143 = arith.index_cast %137 : i32 to index
    %c0_62 = arith.constant 0 : index
    %144 = vector.load %arg3[%143, %c0_62] : memref<24x128xf32, #tpu.memory_space<vmem>>, vector<1x128xf32>
    tpu.vector_store %arg3[%143, %c0_62], %142 {strides = array<i32>} : memref<24x128xf32, #tpu.memory_space<vmem>>, vector<1x128xf32>,
    %c16_i32 = arith.constant 16 : i32
    %c1_i32_63 = arith.constant 1 : i32
    %145 = arith.muli %c16_i32, %c1_i32_63 : i32
    %c0_i32_64 = arith.constant 0 : i32
    %146 = arith.addi %c0_i32_64, %145 : i32
    %147 = arith.addi %0, %146 : i32
    %148 = arith.index_cast %147 : i32 to index
    %149 = memref.load %arg1[%148] : memref<24xi32, #tpu.memory_space<smem>>
    %150 = arith.index_cast %149 : i32 to index
    %c0_65 = arith.constant 0 : index
    %151 = vector.load %arg2[%150, %c0_65] : memref<32x128xf32, #tpu.memory_space<vmem>>, vector<1x128xf32>
    %152 = arith.index_cast %146 : i32 to index
    %c0_66 = arith.constant 0 : index
    %153 = vector.load %arg3[%152, %c0_66] : memref<24x128xf32, #tpu.memory_space<vmem>>, vector<1x128xf32>
    tpu.vector_store %arg3[%152, %c0_66], %151 {strides = array<i32>} : memref<24x128xf32, #tpu.memory_space<vmem>>, vector<1x128xf32>,
    %c17_i32 = arith.constant 17 : i32
    %c1_i32_67 = arith.constant 1 : i32
    %154 = arith.muli %c17_i32, %c1_i32_67 : i32
    %c0_i32_68 = arith.constant 0 : i32
    %155 = arith.addi %c0_i32_68, %154 : i32
    %156 = arith.addi %0, %155 : i32
    %157 = arith.index_cast %156 : i32 to index
    %158 = memref.load %arg1[%157] : memref<24xi32, #tpu.memory_space<smem>>
    %159 = arith.index_cast %158 : i32 to index
    %c0_69 = arith.constant 0 : index
    %160 = vector.load %arg2[%159, %c0_69] : memref<32x128xf32, #tpu.memory_space<vmem>>, vector<1x128xf32>
    %161 = arith.index_cast %155 : i32 to index
    %c0_70 = arith.constant 0 : index
    %162 = vector.load %arg3[%161, %c0_70] : memref<24x128xf32, #tpu.memory_space<vmem>>, vector<1x128xf32>
    tpu.vector_store %arg3[%161, %c0_70], %160 {strides = array<i32>} : memref<24x128xf32, #tpu.memory_space<vmem>>, vector<1x128xf32>,
    %c18_i32 = arith.constant 18 : i32
    %c1_i32_71 = arith.constant 1 : i32
    %163 = arith.muli %c18_i32, %c1_i32_71 : i32
    %c0_i32_72 = arith.constant 0 : i32
    %164 = arith.addi %c0_i32_72, %163 : i32
    %165 = arith.addi %0, %164 : i32
    %166 = arith.index_cast %165 : i32 to index
    %167 = memref.load %arg1[%166] : memref<24xi32, #tpu.memory_space<smem>>
    %168 = arith.index_cast %167 : i32 to index
    %c0_73 = arith.constant 0 : index
    %169 = vector.load %arg2[%168, %c0_73] : memref<32x128xf32, #tpu.memory_space<vmem>>, vector<1x128xf32>
    %170 = arith.index_cast %164 : i32 to index
    %c0_74 = arith.constant 0 : index
    %171 = vector.load %arg3[%170, %c0_74] : memref<24x128xf32, #tpu.memory_space<vmem>>, vector<1x128xf32>
    tpu.vector_store %arg3[%170, %c0_74], %169 {strides = array<i32>} : memref<24x128xf32, #tpu.memory_space<vmem>>, vector<1x128xf32>,
    %c19_i32 = arith.constant 19 : i32
    %c1_i32_75 = arith.constant 1 : i32
    %172 = arith.muli %c19_i32, %c1_i32_75 : i32
    %c0_i32_76 = arith.constant 0 : i32
    %173 = arith.addi %c0_i32_76, %172 : i32
    %174 = arith.addi %0, %173 : i32
    %175 = arith.index_cast %174 : i32 to index
    %176 = memref.load %arg1[%175] : memref<24xi32, #tpu.memory_space<smem>>
    %177 = arith.index_cast %176 : i32 to index
    %c0_77 = arith.constant 0 : index
    %178 = vector.load %arg2[%177, %c0_77] : memref<32x128xf32, #tpu.memory_space<vmem>>, vector<1x128xf32>
    %179 = arith.index_cast %173 : i32 to index
    %c0_78 = arith.constant 0 : index
    %180 = vector.load %arg3[%179, %c0_78] : memref<24x128xf32, #tpu.memory_space<vmem>>, vector<1x128xf32>
    tpu.vector_store %arg3[%179, %c0_78], %178 {strides = array<i32>} : memref<24x128xf32, #tpu.memory_space<vmem>>, vector<1x128xf32>,
    %c20_i32 = arith.constant 20 : i32
    %c1_i32_79 = arith.constant 1 : i32
    %181 = arith.muli %c20_i32, %c1_i32_79 : i32
    %c0_i32_80 = arith.constant 0 : i32
    %182 = arith.addi %c0_i32_80, %181 : i32
    %183 = arith.addi %0, %182 : i32
    %184 = arith.index_cast %183 : i32 to index
    %185 = memref.load %arg1[%184] : memref<24xi32, #tpu.memory_space<smem>>
    %186 = arith.index_cast %185 : i32 to index
    %c0_81 = arith.constant 0 : index
    %187 = vector.load %arg2[%186, %c0_81] : memref<32x128xf32, #tpu.memory_space<vmem>>, vector<1x128xf32>
    %188 = arith.index_cast %182 : i32 to index
    %c0_82 = arith.constant 0 : index
    %189 = vector.load %arg3[%188, %c0_82] : memref<24x128xf32, #tpu.memory_space<vmem>>, vector<1x128xf32>
    tpu.vector_store %arg3[%188, %c0_82], %187 {strides = array<i32>} : memref<24x128xf32, #tpu.memory_space<vmem>>, vector<1x128xf32>,
    %c21_i32 = arith.constant 21 : i32
    %c1_i32_83 = arith.constant 1 : i32
    %190 = arith.muli %c21_i32, %c1_i32_83 : i32
    %c0_i32_84 = arith.constant 0 : i32
    %191 = arith.addi %c0_i32_84, %190 : i32
    %192 = arith.addi %0, %191 : i32
    %193 = arith.index_cast %192 : i32 to index
    %194 = memref.load %arg1[%193] : memref<24xi32, #tpu.memory_space<smem>>
    %195 = arith.index_cast %194 : i32 to index
    %c0_85 = arith.constant 0 : index
    %196 = vector.load %arg2[%195, %c0_85] : memref<32x128xf32, #tpu.memory_space<vmem>>, vector<1x128xf32>
    %197 = arith.index_cast %191 : i32 to index
    %c0_86 = arith.constant 0 : index
    %198 = vector.load %arg3[%197, %c0_86] : memref<24x128xf32, #tpu.memory_space<vmem>>, vector<1x128xf32>
    tpu.vector_store %arg3[%197, %c0_86], %196 {strides = array<i32>} : memref<24x128xf32, #tpu.memory_space<vmem>>, vector<1x128xf32>,
    %c22_i32 = arith.constant 22 : i32
    %c1_i32_87 = arith.constant 1 : i32
    %199 = arith.muli %c22_i32, %c1_i32_87 : i32
    %c0_i32_88 = arith.constant 0 : i32
    %200 = arith.addi %c0_i32_88, %199 : i32
    %201 = arith.addi %0, %200 : i32
    %202 = arith.index_cast %201 : i32 to index
    %203 = memref.load %arg1[%202] : memref<24xi32, #tpu.memory_space<smem>>
    %204 = arith.index_cast %203 : i32 to index
    %c0_89 = arith.constant 0 : index
    %205 = vector.load %arg2[%204, %c0_89] : memref<32x128xf32, #tpu.memory_space<vmem>>, vector<1x128xf32>
    %206 = arith.index_cast %200 : i32 to index
    %c0_90 = arith.constant 0 : index
    %207 = vector.load %arg3[%206, %c0_90] : memref<24x128xf32, #tpu.memory_space<vmem>>, vector<1x128xf32>
    tpu.vector_store %arg3[%206, %c0_90], %205 {strides = array<i32>} : memref<24x128xf32, #tpu.memory_space<vmem>>, vector<1x128xf32>,
    %c23_i32 = arith.constant 23 : i32
    %c1_i32_91 = arith.constant 1 : i32
    %208 = arith.muli %c23_i32, %c1_i32_91 : i32
    %c0_i32_92 = arith.constant 0 : i32
    %209 = arith.addi %c0_i32_92, %208 : i32
    %210 = arith.addi %0, %209 : i32
    %211 = arith.index_cast %210 : i32 to index
    %212 = memref.load %arg1[%211] : memref<24xi32, #tpu.memory_space<smem>>
    %213 = arith.index_cast %212 : i32 to index
    %c0_93 = arith.constant 0 : index
    %214 = vector.load %arg2[%213, %c0_93] : memref<32x128xf32, #tpu.memory_space<vmem>>, vector<1x128xf32>
    %215 = arith.index_cast %209 : i32 to index
    %c0_94 = arith.constant 0 : index
    %216 = vector.load %arg3[%215, %c0_94] : memref<24x128xf32, #tpu.memory_space<vmem>>, vector<1x128xf32>
    tpu.vector_store %arg3[%215, %c0_94], %214 {strides = array<i32>} : memref<24x128xf32, #tpu.memory_space<vmem>>, vector<1x128xf32>,
    %c24_i32_95 = arith.constant 24 : i32
    return
  }
  func.func @transform_0(%arg0: i32, %arg1: memref<24xi32, #tpu.memory_space<smem>>) -> (i32, i32) {
    %c0_i32 = arith.constant 0 : i32
    %c0_i32_0 = arith.constant 0 : i32
    %c0_i32_1 = arith.constant 0 : i32
    return %c0_i32, %c0_i32_0 : i32, i32
  }
  func.func @transform_1(%arg0: i32, %arg1: memref<24xi32, #tpu.memory_space<smem>>) -> (i32, i32) {
    %c0_i32 = arith.constant 0 : i32
    %c0_i32_0 = arith.constant 0 : i32
    return %arg0, %c0_i32 : i32, i32
  }
}

</mosaic_0001>

<bundles_post_ra>
// kernel: _embedding_lookup.1
= control target key start
LH: loop header
LB: loop body
LE: loop exit
PB: predicated region body
PF: predicated region fallthrough
CT: control target
= control target key end

     0   :  { %s360_s0 = inlined_call_operand.hbm [shape: s32[24], index: 0, kind: input, shape index: {}]   ;;  %s361_s1 = inlined_call_operand.hbm [shape: f32[32,128], index: 1, kind: input, shape index: {}]   ;;  %s362_s2 = inlined_call_operand.hbm [shape: f32[24,128], index: 2, kind: output, shape index: {}]  }
   0x1   :  { %s217_s11 = scalar_lea.hbm %s360_s0, 16 }
   0x2   :  { %p218_p0 = scmp.ne.s32.totalorder %s360_s0, %s217_s11  ;;  %p221_p1 = scmp.lt.u32.totalorder %s217_s11, %s360_s0 }
   0x4   :  { %p223_p2 = pnand %p221_p1, %p218_p0 }
   0x6   :  { %226 = shalt.err (!%p223_p2)  }
   0x7   :  { %s277_s16 = smov [#allocation3]  }
   0x8   :  { %8 = dma.hbm_to_smem %s360_s0, 16, %s277_s16, [#allocation2] }
   0x9   :  { %271 = dma.done.wait [#allocation2], 16 }
   0xa   :  { %272 = vsyncadd [#allocation2], 4294967280 }
   0xb   :  { %10 = sfence }
   0xc   :  { %11 = vsyncpa [#allocation5], 0 }
   0xd   :  { %12 = vsyncpa [#allocation6], 0  ;;  %s278_s19 = smov [#allocation4]   ;;  %s227_s23 = scalar_lea.hbm %s361_s1, 512 }
   0xe   :  { %s18_s20 = sshll.u32 %s278_s19, 4  ;;  %p228_p3 = scmp.ne.s32.totalorder %s361_s1, %s227_s23  ;;  %s19_s20 = int_to_ptr.vmem [resolvable:$true] %s18_s20 }
   0xf   :  { %p231_p4 = scmp.lt.u32.totalorder %s227_s23, %s361_s1 }
  0x11   :  { %p233_p5 = pnand %p231_p4, %p228_p3 }
  0x13   :  { %236 = shalt.err (!%p233_p5)
}
  0x14   :  { %s237_s0 = scalar_lea.vmem %s19_s20, 512  ;;  %p242_p7 = scmp.lt.s32.totalorder %s19_s20, %s19_s20 }
  0x15   :  { %p238_p6 = scmp.ne.s32.totalorder %s19_s20, %s237_s0  ;;  %p243_p8 = scmp.lt.s32.totalorder %s237_s0, %s237_s0 }
  0x17   :  { %p244_p9 = por %p243_p8, %p242_p7 }
  0x19   :  { %p245_p10 = pnand %p244_p9, %p238_p6 }
  0x1b   :  { %248 = shalt.err (!%p245_p10)
}
  0x1c   :  { %s279_s28 = smov 128   ;;  %s280_s29 = smov 8  }
  0x1d   :  { %24 = dma.hbm_to_vmem [thread:$0]  %s361_s1, 512, %s19_s20, [#allocation5], %s279_s28, %s279_s28, %s280_s29  }
  0x1e   :  { %273 = dma.done.wait [#allocation5], 512  }
  0x1f   :  { %274 = vsyncadd [#allocation5], 4294966784  ;;  %s29_s4 = sld [smem:[#allocation3]]  ;;  %s189_s5 = sld [smem:[#allocation3 + $0x1]] }
  0x20   :  { %s190_s6 = sld [smem:[#allocation3 + $0x2]]  ;;  %s191_s7 = sld [smem:[#allocation3 + $0x3]] }
  0x21   :  { %s192_s8 = sld [smem:[#allocation3 + $0x4]]  ;;  %s193_s9 = sld [smem:[#allocation3 + $0x5]] }
  0x22   :  { %s194_s10 = sld [smem:[#allocation3 + $0x6]]  ;;  %s195_s11 = sld [smem:[#allocation3 + $0x7]] }
  0x23   :  { %s324_s12 = sld [smem:[#allocation3 + $0x8]]  ;;  %s326_s13 = sld [smem:[#allocation3 + $0x9]] }
  0x24   :  { %s328_s14 = sld [smem:[#allocation3 + $0xa]]  ;;  %s330_s15 = sld [smem:[#allocation3 + $0xb]] }
  0x25   :  { %s30_s16 = scalar_lea.vmem [#allocation4], %s29_s4  ;;  %s35_s1 = scalar_lea.vmem [#allocation4], %s189_s5 }
  0x26   :  { %v31_v0 = vld [vmem:[%s30_s16] sm:$0x1]  ;;  %s40_s17 = scalar_lea.vmem [#allocation4], %s190_s6  ;;  %s45_s18 = scalar_lea.vmem [#allocation4], %s191_s7 }
  0x27   :  { %v36_v1 = vld [vmem:[%s35_s1] sm:$0x1]  ;;  %32 = vst [vmem:[#allocation7] sm:$0x1] %v31_v0  ;;  %s50_s19 = scalar_lea.vmem [#allocation4], %s192_s8  ;;  %s55_s20 = scalar_lea.vmem [#allocation4], %s193_s9 }
  0x28   :  { %37 = vst [vmem:[#allocation7 + $0x1] sm:$0x1] %v36_v1  ;;  %v41_v2 = vld [vmem:[%s40_s17] sm:$0x1]  ;;  %s60_s21 = scalar_lea.vmem [#allocation4], %s194_s10  ;;  %s65_s22 = scalar_lea.vmem [#allocation4], %s195_s11 }
  0x29   :  { %v46_v3 = vld [vmem:[%s45_s18] sm:$0x1]  ;;  %42 = vst [vmem:[#allocation7 + $0x2] sm:$0x1] %v41_v2  ;;  %s70_s23 = scalar_lea.vmem [#allocation4], %s324_s12  ;;  %s75_s24 = scalar_lea.vmem [#allocation4], %s326_s13 }
  0x2a   :  { %47 = vst [vmem:[#allocation7 + $0x3] sm:$0x1] %v46_v3  ;;  %v51_v4 = vld [vmem:[%s50_s19] sm:$0x1]  ;;  %s80_s25 = scalar_lea.vmem [#allocation4], %s328_s14  ;;  %s85_s26 = scalar_lea.vmem [#allocation4], %s330_s15 }
  0x2b   :  { %v56_v5 = vld [vmem:[%s55_s20] sm:$0x1]  ;;  %52 = vst [vmem:[#allocation7 + $0x4] sm:$0x1] %v51_v4  ;;  %s200_s27 = sld [smem:[#allocation3 + $0xc]]  ;;  %s201_s0 = sld [smem:[#allocation3 + $0xd]] }
  0x2c   :  { %57 = vst [vmem:[#allocation7 + $0x5] sm:$0x1] %v56_v5  ;;  %v61_v6 = vld [vmem:[%s60_s21] sm:$0x1]  ;;  %s202_s30 = sld [smem:[#allocation3 + $0xe]]  ;;  %s203_s3 = sld [smem:[#allocation3 + $0xf]] }
  0x2d   :  { %v66_v7 = vld [vmem:[%s65_s22] sm:$0x1]  ;;  %62 = vst [vmem:[#allocation7 + $0x6] sm:$0x1] %v61_v6  ;;  %s204_s4 = sld [smem:[#allocation3 + $0x10]]  ;;  %s205_s5 = sld [smem:[#allocation3 + $0x11]] }
  0x2e   :  { %67 = vst [vmem:[#allocation7 + $0x7] sm:$0x1] %v66_v7  ;;  %v71_v8 = vld [vmem:[%s70_s23] sm:$0x1]  ;;  %s206_s6 = sld [smem:[#allocation3 + $0x12]]  ;;  %s207_s7 = sld [smem:[#allocation3 + $0x13]] }
  0x2f   :  { %v76_v9 = vld [vmem:[%s75_s24] sm:$0x1]  ;;  %72 = vst [vmem:[#allocation7 + $0x8] sm:$0x1] %v71_v8  ;;  %s208_s8 = sld [smem:[#allocation3 + $0x14]]  ;;  %s336_s9 = sld [smem:[#allocation3 + $0x15]] }
  0x30   :  { %77 = vst [vmem:[#allocation7 + $0x9] sm:$0x1] %v76_v9  ;;  %v81_v10 = vld [vmem:[%s80_s25] sm:$0x1]  ;;  %s338_s10 = sld [smem:[#allocation3 + $0x16]]  ;;  %s340_s11 = sld [smem:[#allocation3 + $0x17]] }
  0x31   :  { %v86_v11 = vld [vmem:[%s85_s26] sm:$0x1]  ;;  %82 = vst [vmem:[#allocation7 + $0xa] sm:$0x1] %v81_v10  ;;  %s90_s12 = scalar_lea.vmem [#allocation4], %s200_s27  ;;  %s95_s13 = scalar_lea.vmem [#allocation4], %s201_s0 }
  0x32   :  { %87 = vst [vmem:[#allocation7 + $0xb] sm:$0x1] %v86_v11  ;;  %v91_v12 = vld [vmem:[%s90_s12] sm:$0x1]  ;;  %s100_s14 = scalar_lea.vmem [#allocation4], %s202_s30  ;;  %s105_s15 = scalar_lea.vmem [#allocation4], %s203_s3 }
  0x33   :  { %92 = vst [vmem:[#allocation7 + $0xc] sm:$0x1] %v91_v12  ;;  %v96_v13 = vld [vmem:[%s95_s13] sm:$0x1]  ;;  %s110_s16 = scalar_lea.vmem [#allocation4], %s204_s4  ;;  %s115_s1 = scalar_lea.vmem [#allocation4], %s205_s5 }
  0x34   :  { %v101_v14 = vld [vmem:[%s100_s14] sm:$0x1]  ;;  %97 = vst [vmem:[#allocation7 + $0xd] sm:$0x1] %v96_v13  ;;  %s120_s17 = scalar_lea.vmem [#allocation4], %s206_s6  ;;  %s125_s18 = scalar_lea.vmem [#allocation4], %s207_s7 }
  0x35   :  { %102 = vst [vmem:[#allocation7 + $0xe] sm:$0x1] %v101_v14  ;;  %v106_v15 = vld [vmem:[%s105_s15] sm:$0x1]  ;;  %s130_s19 = scalar_lea.vmem [#allocation4], %s208_s8  ;;  %s135_s20 = scalar_lea.vmem [#allocation4], %s336_s9 }
  0x36   :  { %v111_v16 = vld [vmem:[%s110_s16] sm:$0x1]  ;;  %107 = vst [vmem:[#allocation7 + $0xf] sm:$0x1] %v106_v15  ;;  %s140_s21 = scalar_lea.vmem [#allocation4], %s338_s10  ;;  %s281_s22 = smov [#allocation7]  }
  0x37   :  { %112 = vst [vmem:[#allocation7 + $0x10] sm:$0x1] %v111_v16  ;;  %v116_v17 = vld [vmem:[%s115_s1] sm:$0x1]  ;;  %s153_s23 = sshll.u32 %s281_s22, 4  ;;  %s145_s24 = scalar_lea.vmem [#allocation4], %s340_s11  ;;  %s154_s23 = int_to_ptr.vmem [resolvable:$true] %s153_s23 }
  0x38   :  { %v121_v18 = vld [vmem:[%s120_s17] sm:$0x1]  ;;  %117 = vst [vmem:[#allocation7 + $0x11] sm:$0x1] %v116_v17  ;;  %s249_s25 = scalar_lea.vmem %s154_s23, 384  ;;  %p254_p12 = scmp.lt.s32.totalorder %s154_s23, %s154_s23 }
  0x39   :  { %122 = vst [vmem:[#allocation7 + $0x12] sm:$0x1] %v121_v18  ;;  %v126_v19 = vld [vmem:[%s125_s18] sm:$0x1]  ;;  %p250_p11 = scmp.ne.s32.totalorder %s154_s23, %s249_s25  ;;  %p255_p13 = scmp.lt.s32.totalorder %s249_s25, %s249_s25 }
  0x3a   :  { %v131_v20 = vld [vmem:[%s130_s19] sm:$0x1]  ;;  %127 = vst [vmem:[#allocation7 + $0x13] sm:$0x1] %v126_v19 }
  0x3b   :  { %132 = vst [vmem:[#allocation7 + $0x14] sm:$0x1] %v131_v20  ;;  %v136_v21 = vld [vmem:[%s135_s20] sm:$0x1]  ;;  %p256_p0 = por %p255_p13, %p254_p12 }
  0x3c   :  { %v141_v22 = vld [vmem:[%s140_s21] sm:$0x1]  ;;  %137 = vst [vmem:[#allocation7 + $0x15] sm:$0x1] %v136_v21 }
  0x3d   :  { %142 = vst [vmem:[#allocation7 + $0x16] sm:$0x1] %v141_v22  ;;  %v146_v23 = vld [vmem:[%s145_s24] sm:$0x1]  ;;  %p257_p1 = pnand %p256_p0, %p250_p11 }
  0x3e   :  { %147 = vst [vmem:[#allocation7 + $0x17] sm:$0x1] %v146_v23 }
  0x3f   :  { %260 = shalt.err (!%p257_p1)
}
  0x40   :  { %s261_s0 = scalar_lea.hbm %s362_s2, 384 }
  0x41   :  { %p262_p2 = scmp.ne.s32.totalorder %s362_s2, %s261_s0  ;;  %p265_p3 = scmp.lt.u32.totalorder %s261_s0, %s362_s2 }
  0x43   :  { %p267_p4 = pnand %p265_p3, %p262_p2 }
  0x45   :  { %270 = shalt.err (!%p267_p4)
}
  0x46   :  { %159 = dma.vmem_to_hbm [thread:$0]  %s154_s23, 384, %s362_s2, [#allocation6], %s279_s28, %s279_s28, %s280_s29  }
  0x47   :  { %275 = dma.done.wait [#allocation6], 384  }
  0x48   :  { %276 = vsyncadd [#allocation6], 4294966912 }
  0x49   :  { %163 = vsyncpa [#allocation5], 1 }
  0x4a   :  { %164 = vsyncpa [#allocation6], 1 }

</bundles_post_ra>
